<compile_context>
chip_gen: v7x
topology: tpu7x:2x2x1
jax: 0.10.0
libtpu: 0.0.40
codegen_flags: <defaults>
</compile_context>

<pallas_src>
import functools

import jax
import jax.numpy as jnp
from jax.experimental import pallas as pl
from jax.experimental.pallas import tpu as pltpu

# ----------------------------- config ---------------------------------------
PATCH_SIZE = 4
EMBED_DIM = 32
HEAD_HIDDEN = 64
BOTTLENECK = 32
OUT_DIM = 64
NUM_GLOBAL = 1
NUM_LOCAL = 4
STUDENT_TEMP = 0.1
TEACHER_TEMP = 0.04          # teacher_temp[0] (warmup start)
CENTER_MOMENTUM = 0.9

_LANE = 128
_SUB = 8

# vector-slab row indices (rows 8..11 only exist in the non-shared variant)
_VR_B_PE_S, _VR_B_ENC_S, _VR_GAMMA_S, _VR_BETA_S = 0, 1, 2, 3
_VR_B1, _VR_B2, _VR_B3, _VR_CENTER = 4, 5, 6, 7
_VR_B_PE_T, _VR_B_ENC_T, _VR_GAMMA_T, _VR_BETA_T = 8, 9, 10, 11


def _round_up(x, m):
    return -(-x // m) * m


def _full_spec(shape):
    nd = len(shape)
    return pl.BlockSpec(tuple(shape), lambda i, nd=nd: (0,) * nd)


def _gelu(x):
    # TODO(synk): torch nn.GELU default is exact erf; tanh approximation used here.
    return jax.nn.gelu(x, approximate=True)


def _eye(n, dtype):
    r = jax.lax.broadcasted_iota(jnp.int32, (n, n), 0)
    c = jax.lax.broadcasted_iota(jnp.int32, (n, n), 1)
    return (r == c).astype(dtype)


def _weight_slab_layout(patch_dim, d, h, bn, o, share_backbone):
    """Static row offsets of each weight block inside the packed weight slab."""
    width = _round_up(max(d, 2 * h, 2 * bn, 2 * o), _LANE)
    # block K dims: w_pe_s, w_enc_s, w1_cat, w2_blockdiag, w3_blockdiag, wl_blockdiag
    ks = [patch_dim, d, d, 2 * h, 2 * h, 2 * bn]
    if not share_backbone:
        ks += [patch_dim, d]                      # w_pe_t, w_enc_t
    offs, cur = [], 0
    for k in ks:
        offs.append(cur)
        cur += _round_up(k, _SUB)
    return tuple(offs), cur, width


# --------------------------- fused Pallas kernel ------------------------------
def _vtdino_fused_kernel(
    tokens_ref, pool_ref, wslab_ref, vslab_ref,   # inputs (4 packed operands)
    out_ref,                                       # output: row0=new_center, row1=loss
    *, dims, w_offs, share_backbone,
    student_temp, teacher_temp, center_momentum,
):
    patch_dim, d, h, bn, o, batch, n_global, n_views = dims
    n_s_rows = n_views * batch                    # all (global+local) view rows
    n_t_rows = n_global * batch                   # teacher (global) view rows
    f32 = jnp.float32

    def mm(a, b):
        return jnp.dot(a, b, preferred_element_type=f32)

    def w(idx, k, n):                             # weight block: rows [off, off+k), cols [0, n)
        r0 = w_offs[idx]
        return wslab_ref[r0:r0 + k, 0:n]

    def v(row, n):                                # bias / vector row: (1, n)
        return vslab_ref[row:row + 1, 0:n]

    def layer_norm(x_, g, b):
        mu = jnp.mean(x_, axis=-1, keepdims=True)
        var = jnp.mean(jnp.square(x_ - mu), axis=-1, keepdims=True)
        return (x_ - mu) * jax.lax.rsqrt(var + 1e-5) * g + b

    tokens = tokens_ref[...]                      # (B*Np, Pd)
    pool = pool_ref[...]                          # (n_views*B, B*Np)

    # ---- student backbone: patch-embed -> masked mean pool -> Linear + LN ----
    s_emb = mm(tokens, w(0, patch_dim, d)) + v(_VR_B_PE_S, d)          # (B*Np, D)
    s_pooled = mm(pool, s_emb)                                         # (n_views*B, D)
    s_reg = layer_norm(mm(s_pooled, w(1, d, d)) + v(_VR_B_ENC_S, d),
                       v(_VR_GAMMA_S, d), v(_VR_BETA_S, d))

    if share_backbone:
        # teacher backbone == copy.deepcopy(student) at init (identical weights):
        # its reg tokens are the first n_t_rows rows of the student reg tokens.
        x_head = s_reg
    else:
        t_emb = mm(tokens, w(6, patch_dim, d)) + v(_VR_B_PE_T, d)
        t_pooled = mm(pool[:n_t_rows, :], t_emb)
        t_reg = layer_norm(mm(t_pooled, w(7, d, d)) + v(_VR_B_ENC_T, d),
                           v(_VR_GAMMA_T, d), v(_VR_BETA_T, d))
        x_head = jnp.concatenate([s_reg, t_reg], axis=0)

    # ---- fused student||teacher DINO head (lane-dense, block-diagonal weights) ----
    hh = _gelu(mm(x_head, w(2, d, 2 * h)) + v(_VR_B1, 2 * h))          # (rows, 2H)
    hh = _gelu(mm(hh, w(3, 2 * h, 2 * h)) + v(_VR_B2, 2 * h))          # (rows, 2H)
    hh = mm(hh, w(4, 2 * h, 2 * bn)) + v(_VR_B3, 2 * bn)               # (rows, 2*BN)

    # per-half L2 normalize (F.normalize(p=2, dim=-1, eps=1e-12) per head)
    lane = jax.lax.broadcasted_iota(jnp.int32, hh.shape, 1)
    is_s_half = lane < bn
    sq = hh * hh
    ss_s = jnp.sum(jnp.where(is_s_half, sq, 0.0), axis=-1, keepdims=True)
    ss_t = jnp.sum(jnp.where(is_s_half, 0.0, sq), axis=-1, keepdims=True)
    inv = jnp.where(is_s_half,
                    jax.lax.rsqrt(jnp.maximum(ss_s, 1e-24)),
                    jax.lax.rsqrt(jnp.maximum(ss_t, 1e-24)))
    after = mm(hh * inv, w(5, 2 * bn, 2 * o))                          # (rows, 2*O)

    s_after = after[:n_s_rows, 0:o]                                    # (n_views*B, O)
    if share_backbone:
        t_after = after[:n_t_rows, o:2 * o]                            # (n_global*B, O)
    else:
        t_after = after[n_s_rows:n_s_rows + n_t_rows, o:2 * o]

    # ---- DINO loss (DINOv2 convention: all (student-view, teacher-view) pairs) ----
    center = v(_VR_CENTER, o)                                          # (1, O)
    t_l = (t_after - center) * (1.0 / teacher_temp)
    t_l = t_l - jnp.max(t_l, axis=-1, keepdims=True)
    t_e = jnp.exp(t_l)
    t_prob = t_e / jnp.sum(t_e, axis=-1, keepdims=True)                # exact softmax

    s_l = s_after * (1.0 / student_temp)
    s_l = s_l - jnp.max(s_l, axis=-1, keepdims=True)
    s_lsm = s_l - jnp.log(jnp.sum(jnp.exp(s_l), axis=-1, keepdims=True))

    # per-batch sums over views via tiny selector matmuls; selectors are built
    # in-kernel (horizontal tiling of eye(B)) — rows are ordered (view, batch).
    eye_b = _eye(batch, f32)                                           # (B, B)
    sel_s = jnp.concatenate([eye_b] * n_views, axis=1)                 # (B, n_views*B)
    sel_t = jnp.concatenate([eye_b] * n_global, axis=1)                # (B, n_global*B)
    s_sum = mm(sel_s, s_lsm)                                           # (B, O)
    t_sum = mm(sel_t, t_prob)                                          # (B, O)
    # TODO(synk): DINOLoss source not in the spec; convention kept from previous
    # kernel: sum over all pairs, normalized by batch only.
    loss = -jnp.sum(t_sum * s_sum) * (1.0 / batch)

    # ---- center EMA (DINOLoss.update_center) ----
    batch_center = jnp.mean(t_after, axis=0, keepdims=True)            # (1, O)
    new_center = center * center_momentum + batch_center * (1.0 - center_momentum)

    # single output: row 0 = new center, row 1 = loss broadcast across lanes
    loss_row = jnp.zeros((1, o), f32) + loss
    out_ref[...] = jnp.concatenate([new_center, loss_row], axis=0)


# ------------------------------ glue (JAX) -----------------------------------
def patchify(x, ps):
    # layout: x is NCHW; patches flattened in (C, ph, pw) order.
    B, C, H, W = x.shape
    h, w = H // ps, W // ps
    x = x.reshape(B, C, h, ps, w, ps)
    x = jnp.transpose(x, (0, 2, 4, 1, 3, 5))                    # (B, h, w, C, ps, ps)
    return x.reshape(B, h * w, C * ps * ps)


def build_pool_matrix(masks, B, Np):
    # masks: list of (B, K) int32 patch indices (unique within a row).
    # Returns (P*B, B*Np): row (p, b) mean-pools the masked patches of batch b,
    # so pooled = pool @ emb_flat with emb_flat (B*Np, D) — gather becomes a matmul.
    per_view = []
    for m in masks:
        K = m.shape[1]
        onehot = jax.nn.one_hot(m, Np, dtype=jnp.float32)        # (B, K, Np)
        per_view.append(jnp.sum(onehot, axis=1) * (1.0 / K))     # (B, Np)
    per_view = jnp.stack(per_view, axis=0)                       # (P, B, Np)
    eye = jnp.eye(B, dtype=jnp.float32)
    big = jnp.einsum("pbn,bc->pbcn", per_view, eye)              # (P, B, B, Np)
    return big.reshape(len(masks) * B, B * Np)


def init_params(key, patch_dim, D, hidden, bottleneck, out_dim):
    ks = jax.random.split(key, 12)

    def nrm(k, shape):
        return (0.02 * jax.random.normal(k, shape)).astype(jnp.float32)

    backbone = dict(
        w_pe=nrm(ks[0], (patch_dim, D)), b_pe=jnp.zeros((D,), jnp.float32),
        w_enc=nrm(ks[1], (D, D)), b_enc=jnp.zeros((D,), jnp.float32),
        gamma=jnp.ones((D,), jnp.float32), beta=jnp.zeros((D,), jnp.float32),
    )

    def head(keys):
        return dict(
            w1=nrm(keys[0], (D, hidden)), b1=jnp.zeros((hidden,), jnp.float32),
            w2=nrm(keys[1], (hidden, hidden)), b2=jnp.zeros((hidden,), jnp.float32),
            w3=nrm(keys[2], (hidden, bottleneck)), b3=jnp.zeros((bottleneck,), jnp.float32),
            wl=nrm(keys[3], (bottleneck, out_dim)),
        )

    student_head = head(ks[2:6])
    teacher_head = head(ks[6:10])                 # independent init (second dino_head() call)
    teacher_backbone = dict(backbone)             # copy.deepcopy(encoder): identical weights
    center = jnp.zeros((1, out_dim), jnp.float32)
    return backbone, teacher_backbone, student_head, teacher_head, center


def _pack_operands(params, share_backbone, patch_dim, d, h, bn, o):
    """Pack all weights into one (rows, width) slab and all vectors into one slab."""
    backbone, teacher_backbone, s_head, t_head, center = params
    w_offs, _, width = _weight_slab_layout(patch_dim, d, h, bn, o, share_backbone)

    def pad_block(wm):
        k, n = wm.shape
        return jnp.pad(wm, ((0, _round_up(k, _SUB) - k), (0, width - n)))

    def bdiag(a, b):
        ka, na = a.shape
        kb, nb = b.shape
        top = jnp.concatenate([a, jnp.zeros((ka, nb), a.dtype)], axis=1)
        bot = jnp.concatenate([jnp.zeros((kb, na), b.dtype), b], axis=1)
        return jnp.concatenate([top, bot], axis=0)

    w1_cat = jnp.concatenate([s_head["w1"], t_head["w1"]], axis=1)   # (D, 2H)
    w2_bd = bdiag(s_head["w2"], t_head["w2"])                        # (2H, 2H)
    w3_bd = bdiag(s_head["w3"], t_head["w3"])                        # (2H, 2BN)
    wl_bd = bdiag(s_head["wl"], t_head["wl"])                        # (2BN, 2O)
    blocks = [backbone["w_pe"], backbone["w_enc"], w1_cat, w2_bd, w3_bd, wl_bd]
    if not share_backbone:
        blocks += [teacher_backbone["w_pe"], teacher_backbone["w_enc"]]
    wslab = jnp.concatenate([pad_block(b) for b in blocks], axis=0)

    def vrow(vec):
        vec = vec.reshape(1, -1)
        return jnp.pad(vec, ((0, 0), (0, width - vec.shape[1])))

    rows = [
        vrow(backbone["b_pe"]), vrow(backbone["b_enc"]),
        vrow(backbone["gamma"]), vrow(backbone["beta"]),
        vrow(jnp.concatenate([s_head["b1"], t_head["b1"]])),
        vrow(jnp.concatenate([s_head["b2"], t_head["b2"]])),
        vrow(jnp.concatenate([s_head["b3"], t_head["b3"]])),
        vrow(center.reshape(-1)),
    ]
    if not share_backbone:
        rows += [vrow(teacher_backbone["b_pe"]), vrow(teacher_backbone["b_enc"]),
                 vrow(teacher_backbone["gamma"]), vrow(teacher_backbone["beta"])]
    n_vrows = _round_up(len(rows), _SUB)
    rows += [jnp.zeros((1, width), jnp.float32)] * (n_vrows - len(rows))
    vslab = jnp.concatenate(rows, axis=0)
    return wslab, vslab, w_offs


@functools.partial(jax.jit, static_argnums=(4,))
def _vtdino_forward_impl(x, global_masks, local_masks, params, share_backbone):
    backbone, teacher_backbone, s_head, t_head, center = params
    B = x.shape[0]
    tokens = patchify(x, PATCH_SIZE)                              # (B, Np, patch_dim)
    Np, Pd = tokens.shape[1], tokens.shape[2]
    D = backbone["w_pe"].shape[1]
    H = s_head["w1"].shape[1]
    BN = s_head["w3"].shape[1]
    O = s_head["wl"].shape[1]
    Pg, Pl = len(global_masks), len(local_masks)
    Ptot = Pg + Pl

    tokens_flat = tokens.reshape(B * Np, Pd)
    # global masks first, then local masks; rows ordered (p, b) -> matches '(p b) 1 c'
    pool = build_pool_matrix(list(global_masks) + list(local_masks), B, Np)
    wslab, vslab, w_offs = _pack_operands(params, share_backbone, Pd, D, H, BN, O)

    kernel = functools.partial(
        _vtdino_fused_kernel,
        dims=(Pd, D, H, BN, O, B, Pg, Ptot),
        w_offs=w_offs,
        share_backbone=share_backbone,
        student_temp=STUDENT_TEMP,
        teacher_temp=TEACHER_TEMP,
        center_momentum=CENTER_MOMENTUM,
    )

    args = [tokens_flat, pool, wslab, vslab]
    out = pl.pallas_call(
        kernel,
        out_shape=jax.ShapeDtypeStruct((2, O), jnp.float32),
        grid=(1,),
        in_specs=[_full_spec(a.shape) for a in args],
        out_specs=_full_spec((2, O)),
        compiler_params=pltpu.CompilerParams(
            dimension_semantics=("arbitrary",)),
    )(*args)
    loss = out[1, 0]
    new_center = out[0:1, :]
    return loss, new_center


def vtdino_forward(x, global_masks, local_masks, params, share_backbone=None):
    if share_backbone is None:
        # teacher backbone is a deepcopy of the student at init -> same weight arrays.
        backbone, teacher_backbone = params[0], params[1]
        share_backbone = all(backbone[k] is teacher_backbone[k] for k in backbone)
    return _vtdino_forward_impl(x, global_masks, local_masks, params,
                                bool(share_backbone))


# ------------------------------ main -----------------------------------------
if __name__ == "__main__":
    key = jax.random.PRNGKey(0)
    kx, km, kp = jax.random.split(key, 3)

    B, C, H, W = 2, 4, 16, 16
    x = jax.random.normal(kx, (B, C, H, W), dtype=jnp.float32)

    N = (H // PATCH_SIZE) * (W // PATCH_SIZE)   # 16 patches
    Kg, Kl = 8, 4                               # kept patches per global/local mask

    def make_mask(k, keep):
        # deterministic stand-in for the torch.Generator block-mask sampler
        rows = [jax.random.permutation(jax.random.fold_in(k, b), N)[:keep] for b in range(B)]
        return jnp.stack(rows).astype(jnp.int32)

    mk = jax.random.split(km, NUM_GLOBAL + NUM_LOCAL)
    global_masks = [make_mask(mk[i], Kg) for i in range(NUM_GLOBAL)]
    local_masks = [make_mask(mk[NUM_GLOBAL + i], Kl) for i in range(NUM_LOCAL)]

    params = init_params(kp, C * PATCH_SIZE * PATCH_SIZE,
                         EMBED_DIM, HEAD_HIDDEN, BOTTLENECK, OUT_DIM)

    loss, new_center = vtdino_forward(x, global_masks, local_masks, params)
    jax.block_until_ready((loss, new_center))
    print("KERNEL_OK")
</pallas_src>

<mosaic_0001>
module attributes {stable_mosaic.version = 11 : i64} {
  func.func @_vtdino_fused_kernel(%arg0: i32, %arg1: memref<32x64xf32, #tpu.memory_space<vmem>>, %arg2: memref<10x32xf32, #tpu.memory_space<vmem>>, %arg3: memref<448x128xf32, #tpu.memory_space<vmem>>, %arg4: memref<8x128xf32, #tpu.memory_space<vmem>>, %arg5: memref<2x64xf32, #tpu.memory_space<vmem>>) attributes {dimension_semantics = [#tpu.dimension_semantics<arbitrary>], iteration_bounds = array<i64: 1>, scalar_prefetch = 0 : i64, scratch_operands = 0 : i64, tpu.core_type = #tpu.core_type<tc>, window_params = [{pipeline_mode = #tpu.pipeline_mode<synchronous>, transform_indices = @transform_0, window_bounds = array<i64: 32, 64>}, {pipeline_mode = #tpu.pipeline_mode<synchronous>, transform_indices = @transform_1, window_bounds = array<i64: 10, 32>}, {pipeline_mode = #tpu.pipeline_mode<synchronous>, transform_indices = @transform_2, window_bounds = array<i64: 448, 128>}, {pipeline_mode = #tpu.pipeline_mode<synchronous>, transform_indices = @transform_3, window_bounds = array<i64: 8, 128>}, {pipeline_mode = #tpu.pipeline_mode<synchronous>, transform_indices = @transform_4, window_bounds = array<i64: 2, 64>}]} {
    %c0 = arith.constant 0 : index
    %c0_0 = arith.constant 0 : index
    %0 = vector.load %arg1[%c0, %c0_0] : memref<32x64xf32, #tpu.memory_space<vmem>>, vector<32x64xf32>
    %c0_1 = arith.constant 0 : index
    %c0_2 = arith.constant 0 : index
    %1 = vector.load %arg2[%c0_1, %c0_2] : memref<10x32xf32, #tpu.memory_space<vmem>>, vector<10x32xf32>
    %c0_3 = arith.constant 0 : index
    %c0_4 = arith.constant 0 : index
    %2 = vector.load %arg3[%c0_3, %c0_4] : memref<448x128xf32, #tpu.memory_space<vmem>>, vector<64x32xf32>
    %cst = arith.constant dense<0.000000e+00> : vector<32x32xf32>
    %3 = tpu.matmul %0, %2, %cst {dimension_numbers = #tpu.dot_dimension_numbers<[1], [0], [0], [1], [0, 0, 1, 1], [], []>} : vector<32x64xf32>, vector<64x32xf32>, vector<32x32xf32> -> vector<32x32xf32>
    %c0_5 = arith.constant 0 : index
    %c0_6 = arith.constant 0 : index
    %4 = vector.load %arg4[%c0_5, %c0_6] : memref<8x128xf32, #tpu.memory_space<vmem>>, vector<1x32xf32>
    %5 = vector.broadcast %4 : vector<1x32xf32> to vector<32x32xf32>
    %6 = arith.addf %3, %5 : vector<32x32xf32>
    %cst_7 = arith.constant dense<0.000000e+00> : vector<10x32xf32>
    %7 = tpu.matmul %1, %6, %cst_7 {dimension_numbers = #tpu.dot_dimension_numbers<[1], [0], [0], [1], [0, 0, 1, 1], [], []>} : vector<10x32xf32>, vector<32x32xf32>, vector<10x32xf32> -> vector<10x32xf32>
    %c64 = arith.constant 64 : index
    %c0_8 = arith.constant 0 : index
    %8 = vector.load %arg3[%c64, %c0_8] : memref<448x128xf32, #tpu.memory_space<vmem>>, vector<32x32xf32>
    %cst_9 = arith.constant dense<0.000000e+00> : vector<10x32xf32>
    %9 = tpu.matmul %7, %8, %cst_9 {dimension_numbers = #tpu.dot_dimension_numbers<[1], [0], [0], [1], [0, 0, 1, 1], [], []>} : vector<10x32xf32>, vector<32x32xf32>, vector<10x32xf32> -> vector<10x32xf32>
    %c1 = arith.constant 1 : index
    %c0_10 = arith.constant 0 : index
    %10 = vector.load %arg4[%c1, %c0_10] : memref<8x128xf32, #tpu.memory_space<vmem>>, vector<1x32xf32>
    %11 = vector.broadcast %10 : vector<1x32xf32> to vector<10x32xf32>
    %12 = arith.addf %9, %11 : vector<10x32xf32>
    %c2 = arith.constant 2 : index
    %c0_11 = arith.constant 0 : index
    %13 = vector.load %arg4[%c2, %c0_11] : memref<8x128xf32, #tpu.memory_space<vmem>>, vector<1x32xf32>
    %c3 = arith.constant 3 : index
    %c0_12 = arith.constant 0 : index
    %14 = vector.load %arg4[%c3, %c0_12] : memref<8x128xf32, #tpu.memory_space<vmem>>, vector<1x32xf32>
    %cst_13 = arith.constant dense<0.000000e+00> : vector<10xf32>
    %15 = vector.multi_reduction <add>, %12, %cst_13 [1] : vector<10x32xf32> to vector<10xf32>
    %16 = vector.shape_cast %15 : vector<10xf32> to vector<10x1xf32>
    %cst_14 = arith.constant 3.200000e+01 : f32
    %17 = vector.broadcast %cst_14 : f32 to vector<10x1xf32>
    %18 = arith.divf %16, %17 : vector<10x1xf32>
    %19 = vector.broadcast %18 : vector<10x1xf32> to vector<10x32xf32>
    %20 = arith.subf %12, %19 : vector<10x32xf32>
    %21 = arith.mulf %20, %20 : vector<10x32xf32>
    %cst_15 = arith.constant dense<0.000000e+00> : vector<10xf32>
    %22 = vector.multi_reduction <add>, %21, %cst_15 [1] : vector<10x32xf32> to vector<10xf32>
    %23 = vector.shape_cast %22 : vector<10xf32> to vector<10x1xf32>
    %cst_16 = arith.constant 3.200000e+01 : f32
    %24 = vector.broadcast %cst_16 : f32 to vector<10x1xf32>
    %25 = arith.divf %23, %24 : vector<10x1xf32>
    %26 = vector.broadcast %18 : vector<10x1xf32> to vector<10x32xf32>
    %27 = arith.subf %12, %26 : vector<10x32xf32>
    %cst_17 = arith.constant 9.99999974E-6 : f32
    %28 = vector.broadcast %cst_17 : f32 to vector<10x1xf32>
    %29 = arith.addf %25, %28 : vector<10x1xf32>
    %30 = math.rsqrt %29 : vector<10x1xf32>
    %31 = vector.broadcast %30 : vector<10x1xf32> to vector<10x32xf32>
    %32 = arith.mulf %27, %31 : vector<10x32xf32>
    %33 = vector.broadcast %13 : vector<1x32xf32> to vector<10x32xf32>
    %34 = arith.mulf %32, %33 : vector<10x32xf32>
    %35 = vector.broadcast %14 : vector<1x32xf32> to vector<10x32xf32>
    %36 = arith.addf %34, %35 : vector<10x32xf32>
    %c96 = arith.constant 96 : index
    %c0_18 = arith.constant 0 : index
    %37 = vector.load %arg3[%c96, %c0_18] : memref<448x128xf32, #tpu.memory_space<vmem>>, vector<32x128xf32>
    %cst_19 = arith.constant dense<0.000000e+00> : vector<10x128xf32>
    %38 = tpu.matmul %36, %37, %cst_19 {dimension_numbers = #tpu.dot_dimension_numbers<[1], [0], [0], [1], [0, 0, 1, 1], [], []>} : vector<10x32xf32>, vector<32x128xf32>, vector<10x128xf32> -> vector<10x128xf32>
    %c4 = arith.constant 4 : index
    %c0_20 = arith.constant 0 : index
    %39 = vector.load %arg4[%c4, %c0_20] : memref<8x128xf32, #tpu.memory_space<vmem>>, vector<1x128xf32>
    %40 = vector.broadcast %39 : vector<1x128xf32> to vector<10x128xf32>
    %41 = arith.addf %38, %40 : vector<10x128xf32>
    %42 = arith.mulf %41, %41 : vector<10x128xf32>
    %43 = arith.mulf %41, %42 : vector<10x128xf32>
    %cst_21 = arith.constant 4.471500e-02 : f32
    %44 = vector.broadcast %cst_21 : f32 to vector<10x128xf32>
    %45 = arith.mulf %44, %43 : vector<10x128xf32>
    %46 = arith.addf %41, %45 : vector<10x128xf32>
    %cst_22 = arith.constant 0.797884583 : f32
    %47 = vector.broadcast %cst_22 : f32 to vector<10x128xf32>
    %48 = arith.mulf %47, %46 : vector<10x128xf32>
    %49 = math.tanh %48 : vector<10x128xf32>
    %cst_23 = arith.constant 1.000000e+00 : f32
    %50 = vector.broadcast %cst_23 : f32 to vector<10x128xf32>
    %51 = arith.addf %50, %49 : vector<10x128xf32>
    %cst_24 = arith.constant 5.000000e-01 : f32
    %52 = vector.broadcast %cst_24 : f32 to vector<10x128xf32>
    %53 = arith.mulf %52, %51 : vector<10x128xf32>
    %54 = arith.mulf %41, %53 : vector<10x128xf32>
    %c128 = arith.constant 128 : index
    %c0_25 = arith.constant 0 : index
    %55 = vector.load %arg3[%c128, %c0_25] : memref<448x128xf32, #tpu.memory_space<vmem>>, vector<128x128xf32>
    %cst_26 = arith.constant dense<0.000000e+00> : vector<10x128xf32>
    %56 = tpu.matmul %54, %55, %cst_26 {dimension_numbers = #tpu.dot_dimension_numbers<[1], [0], [0], [1], [0, 0, 1, 1], [], []>} : vector<10x128xf32>, vector<128x128xf32>, vector<10x128xf32> -> vector<10x128xf32>
    %c5 = arith.constant 5 : index
    %c0_27 = arith.constant 0 : index
    %57 = vector.load %arg4[%c5, %c0_27] : memref<8x128xf32, #tpu.memory_space<vmem>>, vector<1x128xf32>
    %58 = vector.broadcast %57 : vector<1x128xf32> to vector<10x128xf32>
    %59 = arith.addf %56, %58 : vector<10x128xf32>
    %60 = arith.mulf %59, %59 : vector<10x128xf32>
    %61 = arith.mulf %59, %60 : vector<10x128xf32>
    %cst_28 = arith.constant 4.471500e-02 : f32
    %62 = vector.broadcast %cst_28 : f32 to vector<10x128xf32>
    %63 = arith.mulf %62, %61 : vector<10x128xf32>
    %64 = arith.addf %59, %63 : vector<10x128xf32>
    %cst_29 = arith.constant 0.797884583 : f32
    %65 = vector.broadcast %cst_29 : f32 to vector<10x128xf32>
    %66 = arith.mulf %65, %64 : vector<10x128xf32>
    %67 = math.tanh %66 : vector<10x128xf32>
    %cst_30 = arith.constant 1.000000e+00 : f32
    %68 = vector.broadcast %cst_30 : f32 to vector<10x128xf32>
    %69 = arith.addf %68, %67 : vector<10x128xf32>
    %cst_31 = arith.constant 5.000000e-01 : f32
    %70 = vector.broadcast %cst_31 : f32 to vector<10x128xf32>
    %71 = arith.mulf %70, %69 : vector<10x128xf32>
    %72 = arith.mulf %59, %71 : vector<10x128xf32>
    %c256 = arith.constant 256 : index
    %c0_32 = arith.constant 0 : index
    %73 = vector.load %arg3[%c256, %c0_32] : memref<448x128xf32, #tpu.memory_space<vmem>>, vector<128x64xf32>
    %cst_33 = arith.constant dense<0.000000e+00> : vector<10x64xf32>
    %74 = tpu.matmul %72, %73, %cst_33 {dimension_numbers = #tpu.dot_dimension_numbers<[1], [0], [0], [1], [0, 0, 1, 1], [], []>} : vector<10x128xf32>, vector<128x64xf32>, vector<10x64xf32> -> vector<10x64xf32>
    %c6 = arith.constant 6 : index
    %c0_34 = arith.constant 0 : index
    %75 = vector.load %arg4[%c6, %c0_34] : memref<8x128xf32, #tpu.memory_space<vmem>>, vector<1x64xf32>
    %76 = vector.broadcast %75 : vector<1x64xf32> to vector<10x64xf32>
    %77 = arith.addf %74, %76 : vector<10x64xf32>
    %78 = tpu.iota {dimensions = array<i32: 1>} : vector<10x64xi32>
    %c32_i32 = arith.constant 32 : i32
    %79 = vector.broadcast %c32_i32 : i32 to vector<10x64xi32>
    %80 = arith.cmpi slt, %78, %79 : vector<10x64xi32>
    %81 = arith.mulf %77, %77 : vector<10x64xf32>
    %cst_35 = arith.constant 0.000000e+00 : f32
    %82 = vector.broadcast %cst_35 : f32 to vector<10x64xf32>
    %83 = arith.select %80, %81, %82 : vector<10x64xi1>, vector<10x64xf32>
    %cst_36 = arith.constant dense<0.000000e+00> : vector<10xf32>
    %84 = vector.multi_reduction <add>, %83, %cst_36 [1] : vector<10x64xf32> to vector<10xf32>
    %85 = vector.shape_cast %84 : vector<10xf32> to vector<10x1xf32>
    %cst_37 = arith.constant 0.000000e+00 : f32
    %86 = vector.broadcast %cst_37 : f32 to vector<10x64xf32>
    %87 = arith.select %80, %86, %81 : vector<10x64xi1>, vector<10x64xf32>
    %cst_38 = arith.constant dense<0.000000e+00> : vector<10xf32>
    %88 = vector.multi_reduction <add>, %87, %cst_38 [1] : vector<10x64xf32> to vector<10xf32>
    %89 = vector.shape_cast %88 : vector<10xf32> to vector<10x1xf32>
    %cst_39 = arith.constant 1.000000e-24 : f32
    %90 = vector.broadcast %cst_39 : f32 to vector<10x1xf32>
    %91 = arith.maximumf %85, %90 : vector<10x1xf32>
    %92 = math.rsqrt %91 : vector<10x1xf32>
    %cst_40 = arith.constant 1.000000e-24 : f32
    %93 = vector.broadcast %cst_40 : f32 to vector<10x1xf32>
    %94 = arith.maximumf %89, %93 : vector<10x1xf32>
    %95 = math.rsqrt %94 : vector<10x1xf32>
    %96 = vector.shape_cast %92 : vector<10x1xf32> to vector<10x1xf32>
    %97 = vector.broadcast %96 : vector<10x1xf32> to vector<10x64xf32>
    %98 = vector.shape_cast %95 : vector<10x1xf32> to vector<10x1xf32>
    %99 = vector.broadcast %98 : vector<10x1xf32> to vector<10x64xf32>
    %100 = arith.select %80, %97, %99 : vector<10x64xi1>, vector<10x64xf32>
    %101 = arith.mulf %77, %100 : vector<10x64xf32>
    %c384 = arith.constant 384 : index
    %c0_41 = arith.constant 0 : index
    %102 = vector.load %arg3[%c384, %c0_41] : memref<448x128xf32, #tpu.memory_space<vmem>>, vector<64x128xf32>
    %cst_42 = arith.constant dense<0.000000e+00> : vector<10x128xf32>
    %103 = tpu.matmul %101, %102, %cst_42 {dimension_numbers = #tpu.dot_dimension_numbers<[1], [0], [0], [1], [0, 0, 1, 1], [], []>} : vector<10x64xf32>, vector<64x128xf32>, vector<10x128xf32> -> vector<10x128xf32>
    %104 = vector.extract_strided_slice %103 {offsets = [0, 0], sizes = [10, 64], strides = [1, 1]} : vector<10x128xf32> to vector<10x64xf32>
    %105 = vector.extract_strided_slice %103 {offsets = [0, 64], sizes = [2, 64], strides = [1, 1]} : vector<10x128xf32> to vector<2x64xf32>
    %c7 = arith.constant 7 : index
    %c0_43 = arith.constant 0 : index
    %106 = vector.load %arg4[%c7, %c0_43] : memref<8x128xf32, #tpu.memory_space<vmem>>, vector<1x64xf32>
    %107 = vector.broadcast %106 : vector<1x64xf32> to vector<2x64xf32>
    %108 = arith.subf %105, %107 : vector<2x64xf32>
    %cst_44 = arith.constant 2.500000e+01 : f32
    %109 = vector.broadcast %cst_44 : f32 to vector<2x64xf32>
    %110 = arith.mulf %108, %109 : vector<2x64xf32>
    %cst_45 = arith.constant dense<0xFF800000> : vector<2xf32>
    %111 = vector.multi_reduction <maximumf>, %110, %cst_45 [1] : vector<2x64xf32> to vector<2xf32>
    %112 = vector.shape_cast %111 : vector<2xf32> to vector<2x1xf32>
    %113 = vector.broadcast %112 : vector<2x1xf32> to vector<2x64xf32>
    %114 = arith.subf %110, %113 : vector<2x64xf32>
    %115 = math.exp %114 : vector<2x64xf32>
    %cst_46 = arith.constant dense<0.000000e+00> : vector<2xf32>
    %116 = vector.multi_reduction <add>, %115, %cst_46 [1] : vector<2x64xf32> to vector<2xf32>
    %117 = vector.shape_cast %116 : vector<2xf32> to vector<2x1xf32>
    %118 = vector.broadcast %117 : vector<2x1xf32> to vector<2x64xf32>
    %119 = arith.divf %115, %118 : vector<2x64xf32>
    %cst_47 = arith.constant 1.000000e+01 : f32
    %120 = vector.broadcast %cst_47 : f32 to vector<10x64xf32>
    %121 = arith.mulf %104, %120 : vector<10x64xf32>
    %cst_48 = arith.constant dense<0xFF800000> : vector<10xf32>
    %122 = vector.multi_reduction <maximumf>, %121, %cst_48 [1] : vector<10x64xf32> to vector<10xf32>
    %123 = vector.shape_cast %122 : vector<10xf32> to vector<10x1xf32>
    %124 = vector.broadcast %123 : vector<10x1xf32> to vector<10x64xf32>
    %125 = arith.subf %121, %124 : vector<10x64xf32>
    %126 = math.exp %125 : vector<10x64xf32>
    %cst_49 = arith.constant dense<0.000000e+00> : vector<10xf32>
    %127 = vector.multi_reduction <add>, %126, %cst_49 [1] : vector<10x64xf32> to vector<10xf32>
    %128 = vector.shape_cast %127 : vector<10xf32> to vector<10x1xf32>
    %129 = math.log %128 : vector<10x1xf32>
    %130 = vector.broadcast %129 : vector<10x1xf32> to vector<10x64xf32>
    %131 = arith.subf %125, %130 : vector<10x64xf32>
    %132 = tpu.iota {dimensions = array<i32: 0>} : vector<2x2xi32>
    %133 = tpu.iota {dimensions = array<i32: 1>} : vector<2x2xi32>
    %134 = arith.cmpi eq, %132, %133 : vector<2x2xi32>
    %135 = arith.extui %134 : vector<2x2xi1> to vector<2x2xi32>
    %136 = arith.sitofp %135 : vector<2x2xi32> to vector<2x2xf32>
    %137 = tpu.concatenate %136, %136, %136, %136, %136 in 1 : vector<2x2xf32>, vector<2x2xf32>, vector<2x2xf32>, vector<2x2xf32>, vector<2x2xf32> -> vector<2x10xf32>
    %cst_50 = arith.constant dense<0.000000e+00> : vector<2x64xf32>
    %138 = tpu.matmul %137, %131, %cst_50 {dimension_numbers = #tpu.dot_dimension_numbers<[1], [0], [0], [1], [0, 0, 1, 1], [], []>} : vector<2x10xf32>, vector<10x64xf32>, vector<2x64xf32> -> vector<2x64xf32>
    %cst_51 = arith.constant dense<0.000000e+00> : vector<2x64xf32>
    %139 = tpu.matmul %136, %119, %cst_51 {dimension_numbers = #tpu.dot_dimension_numbers<[1], [0], [0], [1], [0, 0, 1, 1], [], []>} : vector<2x2xf32>, vector<2x64xf32>, vector<2x64xf32> -> vector<2x64xf32>
    %140 = arith.mulf %139, %138 : vector<2x64xf32>
    %141 = vector.shape_cast %140 : vector<2x64xf32> to vector<1x2x64xf32>
    %cst_52 = arith.constant dense<0.000000e+00> : vector<1xf32>
    %142 = vector.multi_reduction <add>, %141, %cst_52 [1, 2] : vector<1x2x64xf32> to vector<1xf32>
    %143 = vector.shape_cast %142 : vector<1xf32> to vector<1x1x1xf32>
    %144 = vector.extract %143[0, 0, 0] : f32 from vector<1x1x1xf32>
    %cst_53 = arith.constant 0.000000e+00 : f32
    %145 = arith.subf %cst_53, %144 : f32
    %cst_54 = arith.constant 5.000000e-01 : f32
    %146 = arith.mulf %145, %cst_54 : f32
    %cst_55 = arith.constant dense<0.000000e+00> : vector<64xf32>
    %147 = vector.multi_reduction <add>, %105, %cst_55 [0] : vector<2x64xf32> to vector<64xf32>
    %148 = vector.shape_cast %147 : vector<64xf32> to vector<1x64xf32>
    %cst_56 = arith.constant 2.000000e+00 : f32
    %149 = vector.broadcast %cst_56 : f32 to vector<1x64xf32>
    %150 = arith.divf %148, %149 : vector<1x64xf32>
    %cst_57 = arith.constant 0.899999976 : f32
    %151 = vector.broadcast %cst_57 : f32 to vector<1x64xf32>
    %152 = arith.mulf %106, %151 : vector<1x64xf32>
    %cst_58 = arith.constant 1.000000e-01 : f32
    %153 = vector.broadcast %cst_58 : f32 to vector<1x64xf32>
    %154 = arith.mulf %150, %153 : vector<1x64xf32>
    %155 = arith.addf %152, %154 : vector<1x64xf32>
    %cst_59 = arith.constant 0.000000e+00 : f32
    %156 = vector.broadcast %cst_59 : f32 to vector<1x64xf32>
    %157 = vector.broadcast %146 : f32 to vector<1x64xf32>
    %158 = arith.addf %156, %157 : vector<1x64xf32>
    %159 = tpu.concatenate %155, %158 in 0 : vector<1x64xf32>, vector<1x64xf32> -> vector<2x64xf32>
    %c0_60 = arith.constant 0 : index
    %c0_61 = arith.constant 0 : index
    %160 = vector.load %arg5[%c0_60, %c0_61] : memref<2x64xf32, #tpu.memory_space<vmem>>, vector<2x64xf32>
    tpu.vector_store %arg5[%c0_60, %c0_61], %159 {strides = array<i32>} : memref<2x64xf32, #tpu.memory_space<vmem>>, vector<2x64xf32>,
    return
  }
  func.func @transform_0(%arg0: i32) -> (i32, i32) {
    %c0_i32 = arith.constant 0 : i32
    %c0_i32_0 = arith.constant 0 : i32
    %c0_i32_1 = arith.constant 0 : i32
    return %c0_i32, %c0_i32_0 : i32, i32
  }
  func.func @transform_1(%arg0: i32) -> (i32, i32) {
    %c0_i32 = arith.constant 0 : i32
    %c0_i32_0 = arith.constant 0 : i32
    %c0_i32_1 = arith.constant 0 : i32
    return %c0_i32, %c0_i32_0 : i32, i32
  }
  func.func @transform_2(%arg0: i32) -> (i32, i32) {
    %c0_i32 = arith.constant 0 : i32
    %c0_i32_0 = arith.constant 0 : i32
    %c0_i32_1 = arith.constant 0 : i32
    return %c0_i32, %c0_i32_0 : i32, i32
  }
  func.func @transform_3(%arg0: i32) -> (i32, i32) {
    %c0_i32 = arith.constant 0 : i32
    %c0_i32_0 = arith.constant 0 : i32
    %c0_i32_1 = arith.constant 0 : i32
    return %c0_i32, %c0_i32_0 : i32, i32
  }
  func.func @transform_4(%arg0: i32) -> (i32, i32) {
    %c0_i32 = arith.constant 0 : i32
    %c0_i32_0 = arith.constant 0 : i32
    %c0_i32_1 = arith.constant 0 : i32
    return %c0_i32, %c0_i32_0 : i32, i32
  }
}

</mosaic_0001>

<bundles_post_ra>
// kernel: _vtdino_forward_impl.1
= control target key start
LH: loop header
LB: loop body
LE: loop exit
PB: predicated region body
PF: predicated region fallthrough
CT: control target
= control target key end

     0   :  { %vm36_vm0 = vcmask 523264   ;;  %vm134_vm1 = vcmask 261120   ;;  %vm311_vm2 = vcmask 254976   ;;  %vm676_vm4 = vcmask 517120   ;;  %s1493_s17 = smov 8   ;;  %s1494_s18 = smov 2   ;;  %s1812_s2 = inlined_call_operand.vmem [shape: f32[448,128], index: 2, kind: input, shape index: {}]   ;;  %s1813_s0 = inlined_call_operand.vmem [shape: f32[32,64], index: 0, kind: input, shape index: {}]   ;;  %s1814_s1 = inlined_call_operand.vmem [shape: f32[10,32], index: 1, kind: input, shape index: {}]   ;;  %s1815_s3 = inlined_call_operand.vmem [shape: f32[8,128], index: 3, kind: input, shape index: {}]   ;;  %s1816_s4 = inlined_call_operand.vmem [shape: f32[2,64], index: 4, kind: output, shape index: {}]  }
   0x1   :  { %v23_v0 = vld [vmem:[%s1812_s2] sm:$0xff]  ;;  %v24_v1 = vld [vmem:[%s1812_s2 + $0x8] sm:$0xff]  ;;  %v25_v2 = vld [vmem:[%s1812_s2 + $0x10] sm:$0xff]  ;;  %vm800_vm5 = vcmask 1041920   ;;  %vm1496_vm7 = vmmov 0   ;;  %vm860_vm8 = vcmask 15360  }
   0x2   :  { %v1322_v3 = vpack.c.bf16 %v24_v1, %v23_v0  ;;  %v26_v4 = vld [vmem:[%s1812_s2 + $0x18] sm:$0xff]  ;;  %v27_v6 = vld [vmem:[%s1812_s2 + $0x20] sm:$0xff]  ;;  %v28_v7 = vld [vmem:[%s1812_s2 + $0x28] sm:$0xff]  ;;  %vm862_vm9 = vcmask 31744   ;;  %vm872_vm10 = vcmask 1041408   ;;  %vm864_vm11 = vcmask 48128  }
   0x3   :  { %v1326_v5 = vpack.c.bf16 %v26_v4, %v25_v2  ;;  %v17_v8 = vld [vmem:[%s1813_s0] sm:$0xff]  ;;  %v1330_v9 = vpack.c.bf16 %v28_v7, %v27_v6  ;;  %v29_v10 = vld [vmem:[%s1812_s2 + $0x30] sm:$0xff]  ;;  %v30_v11 = vld [vmem:[%s1812_s2 + $0x38] sm:$0xff]  ;;  %vm1497_vm12 = vmmov 1   ;;  %vm866_vm14 = vcmask 64512  }
   0x4   :  { %1323 = vmatprep.subr.bf16.mxu0 %v1322_v3  ;;  %1182 = vmatprep.mubr.msk.f32.mxu0 %vm36_vm0, %v17_v8  ;;  %v1334_v12 = vpack.c.bf16 %v30_v11, %v29_v10  ;;  %v18_v13 = vld [vmem:[%s1813_s0 + $0x8] sm:$0xff]  ;;  %v19_v14 = vld [vmem:[%s1813_s0 + $0x10] sm:$0xff]  ;;  %v20_v15 = vld [vmem:[%s1813_s0 + $0x18] sm:$0xff]  ;;  %s1489_s0 = smov 64   ;;  %vm868_vm15 = vcmask 80896  }
   0x5   :  { %1325 = vmatpush3.bf16.msra.mxu0 %v1322_v3  ;;  %v21_v16 = vld [vmem:[%s1814_s1] sm:$0xff]  ;;  %v217_v27 = vld [vmem:[%s1812_s2 + $0x48] sm:$0xff]  ;;  %v218_v31 = vld [vmem:[%s1812_s2 + $0x50] sm:$0xff] }
   0x6   :  { %1327 = vmatprep.subr.bf16.mxu0 %v1326_v5  ;;  %1196 = vmatprep.mubr.msk.f32.mxu1 %vm134_vm1, %v21_v16  ;;  %v1061_v17 = vld [vmem:[%s1815_s3] ss:$0 sm:$0xff]  ;;  %v219_v32 = vld [vmem:[%s1812_s2 + $0x58] sm:$0xff]  ;;  %v22_v33 = vld [vmem:[%s1814_s1 + $0x8] sm:$0x3] }
   0x7   :  { %v216_v26 = vld [vmem:[%s1812_s2 + $0x40] sm:$0xff]  ;;  %v1350_v34 = vpack.c.bf16 %v219_v32, %v218_v31  ;;  %v349_v55 = vld [vmem:[%s1812_s2 + $0x68] sm:$0xff]  ;;  %v350_v57 = vld [vmem:[%s1812_s2 + $0x70] sm:$0xff] }
   0x8   :  { %v1346_v30 = vpack.c.bf16 %v217_v27, %v216_v26  ;;  %v1068_v37 = vld [vmem:[%s1815_s3 + $0x1] ss:$0 sm:$0xff]  ;;  %v351_v58 = vld [vmem:[%s1812_s2 + $0x78] sm:$0xff]  ;;  %v1071_v3 = vld [vmem:[%s1815_s3 + $0x2] ss:$0 sm:$0xff] }
   0x9   :  { %1329 = vmatpush3.bf16.msra.mxu0 %v1326_v5  ;;  %v348_v54 = vld [vmem:[%s1812_s2 + $0x60] sm:$0xff]  ;;  %v1358_v59 = vpack.c.bf16 %v351_v58, %v350_v57  ;;  %v459_v16 = vld [vmem:[%s1812_s2 + $0x98] sm:$0xff]  ;;  %v466_v26 = vld [vmem:[%s1812_s2 + $0xd0] sm:$0xff] }
   0xa   :  { %1331 = vmatprep.subr.bf16.mxu0 %v1330_v9  ;;  %v1354_v56 = vpack.c.bf16 %v349_v55, %v348_v54  ;;  %v1072_v5 = vld [vmem:[%s1815_s3 + $0x3] ss:$0 sm:$0xff]  ;;  %v469_v31 = vld [vmem:[%s1812_s2 + $0xe8] sm:$0xff]  ;;  %vm1444_vm13 = vmpackc.low %vm872_vm10, %vm1497_vm12 }
   0xd   :  { %1333 = vmatpush3.bf16.msra.mxu0 %v1330_v9 }
   0xe   :  { %1335 = vmatprep.subr.bf16.mxu0 %v1334_v12 }
  0x11   :  { %1337 = vmatpush3.bf16.msra.mxu0 %v1334_v12  ;;  %v456_v12 = vld [vmem:[%s1812_s2 + $0x80] sm:$0xff] }
  0x12   :  { %1355 = vmatprep.subr.bf16.mxu0 %v1354_v56 }
  0x14   :  { %1183 = vmatmul.mubr.msk.f32.vlgmr.msra.gmra.mrb[0].mxu0 %vm36_vm0, %v18_v13  ;;  %v457_v13 = vld [vmem:[%s1812_s2 + $0x88] sm:$0xff] }
  0x15   :  { %1185 = vmatprep.mubr.msk.f32.mxu0 %vm36_vm0, %v19_v14  ;;  %1357 = vmatpush3.bf16.msra.mxu0 %v1354_v56  ;;  %v1362_v14 = vpack.c.bf16 %v457_v13, %v456_v12  ;;  %v582_v13 = vld [vmem:[%s1812_s2 + $0x160] sm:$0xff] }
  0x16   :  { %1359 = vmatprep.subr.bf16.mxu0 %v1358_v59 }
  0x18   :  { %1186 = vmatmul.mubr.msk.f32.gmra.mrb[2].mxu0 %vm36_vm0, %v20_v15  ;;  %v458_v15 = vld [vmem:[%s1812_s2 + $0x90] sm:$0xff] }
  0x19   :  { %1361 = vmatpush3.bf16.msra.mxu0 %v1358_v59  ;;  %v570_v59 = vld [vmem:[%s1812_s2 + $0x100] sm:$0xff] }
  0xe7   :  { %v1184_v18 = vpop.f32.mrb[0].mxu0 }
  0xe8   :  { %v121_v19 = vadd.f32 %v1184_v18, %v1061_v17  ;;  %v115_v20 = vpop.f32.mrb[1].mxu0  ;;  %v460_v18 = vld [vmem:[%s1812_s2 + $0xa0] sm:$0xff] }
  0xe9   :  { %v116_v21 = vadd.f32 %v1061_v17, %v115_v20 }
  0xeb   :  { %v1187_v22 = vpop.f32.mrb[2].mxu0  ;;  %v1338_v23 = vpack.c.bf16 %v121_v19, %v116_v21  ;;  %v461_v19 = vld [vmem:[%s1812_s2 + $0xa8] sm:$0xff]  ;;  %v462_v21 = vld [vmem:[%s1812_s2 + $0xb0] sm:$0xff] }
  0xec   :  { %v131_v24 = vadd.f32 %v1187_v22, %v1061_v17  ;;  %v125_v25 = vpop.f32.mrb[3].mxu0  ;;  %v1370_v20 = vpack.c.bf16 %v461_v19, %v460_v18  ;;  %v463_v22 = vld [vmem:[%s1812_s2 + $0xb8] sm:$0xff]  ;;  %v1076_v19 = vld [vmem:[%s1815_s3 + $0x5] ss:$0 sm:$0xff] }
  0xed   :  { %v126_v28 = vadd.f32 %v1061_v17, %v125_v25  ;;  %1339 = vmatprep.subr.bf16.mxu1 %v1338_v23  ;;  %v1366_v17 = vpack.c.bf16 %v459_v16, %v458_v15  ;;  %v465_v25 = vld [vmem:[%s1812_s2 + $0xc8] sm:$0xff]  ;;  %v584_v16 = vld [vmem:[%s1812_s2 + $0x170] sm:$0xff] }
  0xee   :  { %1341 = vmatpush3.bf16.msra.mxu1 %v1338_v23  ;;  %v1374_v23 = vpack.c.bf16 %v463_v22, %v462_v21 }
  0xef   :  { %v1342_v29 = vpack.c.bf16 %v131_v24, %v126_v28  ;;  %v464_v24 = vld [vmem:[%s1812_s2 + $0xc0] sm:$0xff]  ;;  %v467_v28 = vld [vmem:[%s1812_s2 + $0xd8] sm:$0xff] }
  0xf0   :  { %v1378_v27 = vpack.c.bf16 %v465_v25, %v464_v24 }
  0xf1   :  { %1343 = vmatprep.subr.bf16.mxu1 %v1342_v29 }
  0xf2   :  { %1345 = vmatpush3.bf16.msra.mxu1 %v1342_v29  ;;  %v1382_v29 = vpack.c.bf16 %v467_v28, %v466_v26 }
  0xf3   :  { %1347 = vmatprep.subr.bf16.mxu1 %v1346_v30 }
  0xf5   :  { %1197 = vmatmul.mubr.msk.f32.vlgmr.msra.gmra.mrb[0].mxu1 %vm134_vm1, %v22_v33  ;;  %v470_v33 = vld [vmem:[%s1812_s2 + $0xf0] sm:$0xff] }
  0xf6   :  { %1349 = vmatpush3.bf16.msra.mxu1 %v1346_v30  ;;  %v468_v30 = vld [vmem:[%s1812_s2 + $0xe0] sm:$0xff] }
  0xf7   :  { %1351 = vmatprep.subr.bf16.mxu1 %v1350_v34  ;;  %v1386_v32 = vpack.c.bf16 %v469_v31, %v468_v30 }
  0xfa   :  { %1353 = vmatpush3.bf16.msra.mxu1 %v1350_v34  ;;  %v471_v34 = vld [vmem:[%s1812_s2 + $0xf8] sm:$0xff] }
  0xfb   :  { %1363 = vmatprep.subr.bf16.mxu1 %v1362_v14 }
 0x1c8   :  { %v1198_v35 = vpop.f32.mrb[0].mxu1 }
 0x1c9   :  { %v207_v36 = vpop.f32.mrb[1].mxu1 }
 0x1ca   :  { %1207 = vmatprep.mubr.msk.f32.mxu1 %vm134_vm1, %v207_v36  ;;  %v1073_v36 = vld [vmem:[%s1815_s3 + $0x4] ss:$0 sm:$0xff] }
 0x1cb   :  { %1208 = vmatmul.mubr.msk.f32.vlgmr.msra.gmra.mrb[2].mxu1 %vm134_vm1, %v1198_v35  ;;  %v1390_v35 = vpack.c.bf16 %v471_v34, %v470_v33 }
 0x1cc   :  { %1365 = vmatpush3.bf16.msra.mxu1 %v1362_v14  ;;  %v583_v14 = vld [vmem:[%s1812_s2 + $0x168] sm:$0xff] }
 0x1cd   :  { %1367 = vmatprep.subr.bf16.mxu1 %v1366_v17  ;;  %v1418_v15 = vpack.c.bf16 %v583_v14, %v582_v13 }
 0x1d0   :  { %1369 = vmatpush3.bf16.msra.mxu1 %v1366_v17  ;;  %v585_v17 = vld [vmem:[%s1812_s2 + $0x178] sm:$0xff] }
 0x1d1   :  { %1371 = vmatprep.subr.bf16.mxu1 %v1370_v20  ;;  %v1422_v18 = vpack.c.bf16 %v585_v17, %v584_v16 }
 0x1d4   :  { %1373 = vmatpush3.bf16.msra.mxu1 %v1370_v20 }
 0x1d5   :  { %1375 = vmatprep.subr.bf16.mxu1 %v1374_v23 }
 0x1d8   :  { %1377 = vmatpush3.bf16.msra.mxu1 %v1374_v23 }
 0x1d9   :  { %1379 = vmatprep.subr.bf16.mxu1 %v1378_v27 }
 0x1dc   :  { %1381 = vmatpush3.bf16.msra.mxu1 %v1378_v27 }
 0x1dd   :  { %1383 = vmatprep.subr.bf16.mxu1 %v1382_v29 }
 0x1e0   :  { %1385 = vmatpush3.bf16.msra.mxu1 %v1382_v29 }
 0x1e1   :  { %1387 = vmatprep.subr.bf16.mxu1 %v1386_v32 }
 0x1e4   :  { %1389 = vmatpush3.bf16.msra.mxu1 %v1386_v32 }
 0x1e5   :  { %1391 = vmatprep.subr.bf16.mxu1 %v1390_v35 }
 0x1e8   :  { %1393 = vmatpush3.bf16.msra.mxu1 %v1390_v35 }
 0x29e   :  { %v1209_v38 = vpop.f32.mrb[2].mxu1 }
 0x29f   :  { %v297_v39 = vpop.f32.mrb[3].mxu1  ;;  %v303_v41 = vadd.f32 %v1209_v38, %v1068_v37 }
 0x2a0   :  { %v298_v40 = vadd.f32 %v1068_v37, %v297_v39 }
 0x2a1   :  { %v312_v43 = vsel %vm311_vm2, %v303_v41, 0.0 }
 0x2a2   :  { %v308_v42 = vsel %vm134_vm1, %v298_v40, 0.0 }
 0x2a3   :  { %309 = vadd.xlane.f32.xlu0 %v308_v42 }
 0x2a7   :  { %313 = vadd.xlane.f32.xlu0 %v312_v43 }
 0x330   :  { %v310_v44 = vpop.xlane.xlu0 %309 }
 0x331   :  { %v316_v45 = vmul.f32 0.03125, %v310_v44 }
 0x333   :  { %v318_v46 = vsub.f32 %v298_v40, %v316_v45 }
 0x334   :  { %v314_v47 = vpop.xlane.xlu0 %313 }
 0x335   :  { %v317_v48 = vmul.f32 0.03125, %v314_v47  ;;  %v320_v49 = vmul.f32 %v318_v46, %v318_v46 }
 0x337   :  { %v319_v50 = vsub.f32 %v303_v41, %v317_v48  ;;  %v322_v51 = vsel %vm134_vm1, %v320_v49, 0.0 }
 0x338   :  { %323 = vadd.xlane.f32.xlu1 %v322_v51 }
 0x339   :  { %v321_v52 = vmul.f32 %v319_v50, %v319_v50 }
 0x33b   :  { %v325_v53 = vsel %vm311_vm2, %v321_v52, 0.0 }
 0x33c   :  { %326 = vadd.xlane.f32.xlu1 %v325_v53 }
 0x3c5   :  { %v324_v60 = vpop.xlane.xlu1 %323 }
 0x3c6   :  { %v328_v61 = vmul.f32 0.03125, %v324_v60  ;;  %v571_v60 = vld [vmem:[%s1812_s2 + $0x108] sm:$0xff] }
 0x3c8   :  { %v330_v62 = vadd.f32 1e-05, %v328_v61  ;;  %v1394_v61 = vpack.c.bf16 %v571_v60, %v570_v59  ;;  %v700_v59 = vld [vmem:[%s1812_s2 + $0x180] sm:$0xff]  ;;  %v701_v60 = vld [vmem:[%s1812_s2 + $0x188] sm:$0xff] }
 0x3c9   :  { %v327_v63 = vpop.xlane.xlu1 %326 }
 0x3ca   :  { %1457 = vrsqrt.f32 %v330_v62  ;;  %v329_v0 = vmul.f32 0.03125, %v327_v63  ;;  %1395 = vmatprep.subr.bf16.mxu0 %v1394_v61  ;;  %v572_v62 = vld [vmem:[%s1812_s2 + $0x110] sm:$0xff]  ;;  %v573_v63 = vld [vmem:[%s1812_s2 + $0x118] sm:$0xff] }
 0x3cc   :  { %v331_v1 = vadd.f32 1e-05, %v329_v0  ;;  %v1398_v0 = vpack.c.bf16 %v573_v63, %v572_v62  ;;  %v702_v62 = vld [vmem:[%s1812_s2 + $0x190] sm:$0xff]  ;;  %v703_v63 = vld [vmem:[%s1812_s2 + $0x198] sm:$0xff] }
 0x3ce   :  { %1459 = vrsqrt.f32 %v331_v1  ;;  %v574_v1 = vld [vmem:[%s1812_s2 + $0x120] sm:$0xff] }
 0x3d4   :  { %v1458_v2 = vpop.eup %1457 }
 0x3d5   :  { %v334_v4 = vmul.f32 %v1458_v2, %v318_v46  ;;  %v575_v2 = vld [vmem:[%s1812_s2 + $0x128] sm:$0xff] }
 0x3d7   :  { %v340_v6 = vmul.f32 %v1071_v3, %v334_v4  ;;  %v576_v4 = vld [vmem:[%s1812_s2 + $0x130] sm:$0xff] }
 0x3d8   :  { %v1460_v7 = vpop.eup %1459 }
 0x3d9   :  { %v335_v8 = vmul.f32 %v1460_v7, %v319_v50  ;;  %v346_v9 = vadd.f32 %v1072_v5, %v340_v6  ;;  %v578_v7 = vld [vmem:[%s1812_s2 + $0x140] sm:$0xff] }
 0x3db   :  { %v341_v10 = vmul.f32 %v1071_v3, %v335_v8  ;;  %1218 = vmatprep.mubr.msk.f32.mxu0 %vm134_vm1, %v346_v9  ;;  %v1402_v3 = vpack.c.bf16 %v575_v2, %v574_v1  ;;  %v579_v8 = vld [vmem:[%s1812_s2 + $0x148] sm:$0xff]  ;;  %v580_v9 = vld [vmem:[%s1812_s2 + $0x150] sm:$0xff]  ;;  %v704_v1 = vld [vmem:[%s1812_s2 + $0x1a0] sm:$0xff] }
 0x3dc   :  { %v705_v2 = vld [vmem:[%s1812_s2 + $0x1a8] sm:$0xff] }
 0x3dd   :  { %v347_v11 = vadd.f32 %v1072_v5, %v341_v10  ;;  %v577_v5 = vld [vmem:[%s1812_s2 + $0x138] sm:$0xff]  ;;  %v1410_v10 = vpack.c.bf16 %v579_v8, %v578_v7  ;;  %v1764_v8 = vld [vmem:[%s1815_s3 + $0x7] sm:$0x1] }
 0x3de   :  { %v1406_v6 = vpack.c.bf16 %v577_v5, %v576_v4  ;;  %v706_v4 = vld [vmem:[%s1812_s2 + $0x1b0] sm:$0xff]  ;;  %v707_v5 = vld [vmem:[%s1812_s2 + $0x1b8] sm:$0xff] }
 0x3df   :  { %1219 = vmatmul.mubr.msk.f32.vlgmr.msra.gmra.mrb[4].mxu0 %vm134_vm1, %v347_v11  ;;  %v581_v11 = vld [vmem:[%s1812_s2 + $0x158] sm:$0xff]  ;;  %s1491_s2 = smov 4  }
 0x3e0   :  { %1397 = vmatpush3.bf16.msra.mxu0 %v1394_v61  ;;  %v1414_v12 = vpack.c.bf16 %v581_v11, %v580_v9  ;;  %v1426_v61 = vpack.c.bf16 %v701_v60, %v700_v59 }
 0x3e1   :  { %1399 = vmatprep.subr.bf16.mxu0 %v1398_v0 }
 0x3e2   :  { %1427 = vmatprep.subr.bf16.mxu1 %v1426_v61 }
 0x3e4   :  { %1401 = vmatpush3.bf16.msra.mxu0 %v1398_v0  ;;  %v1430_v0 = vpack.c.bf16 %v703_v63, %v702_v62 }
 0x3e5   :  { %1403 = vmatprep.subr.bf16.mxu0 %v1402_v3 }
 0x3e8   :  { %1405 = vmatpush3.bf16.msra.mxu0 %v1402_v3  ;;  %v1434_v3 = vpack.c.bf16 %v705_v2, %v704_v1 }
 0x3e9   :  { %1407 = vmatprep.subr.bf16.mxu0 %v1406_v6 }
 0x3ec   :  { %1409 = vmatpush3.bf16.msra.mxu0 %v1406_v6  ;;  %v1438_v6 = vpack.c.bf16 %v707_v5, %v706_v4 }
 0x3ed   :  { %1411 = vmatprep.subr.bf16.mxu0 %v1410_v10 }
 0x3f0   :  { %1413 = vmatpush3.bf16.msra.mxu0 %v1410_v10 }
 0x3f1   :  { %1415 = vmatprep.subr.bf16.mxu0 %v1414_v12 }
 0x3f4   :  { %1417 = vmatpush3.bf16.msra.mxu0 %v1414_v12 }
 0x3f5   :  { %1419 = vmatprep.subr.bf16.mxu0 %v1418_v15 }
 0x3f8   :  { %1421 = vmatpush3.bf16.msra.mxu0 %v1418_v15 }
 0x3f9   :  { %1423 = vmatprep.subr.bf16.mxu0 %v1422_v18 }
 0x3fc   :  { %1425 = vmatpush3.bf16.msra.mxu0 %v1422_v18 }
 0x4b2   :  { %v1220_v37 = vpop.f32.mrb[4].mxu0 }
 0x4b3   :  { %v435_v38 = vadd.f32 %v1220_v37, %v1073_v36  ;;  %v429_v39 = vpop.f32.mrb[5].mxu0 }
 0x4b4   :  { %v430_v40 = vadd.f32 %v1073_v36, %v429_v39 }
 0x4b5   :  { %v439_v41 = vmul.f32 %v435_v38, %v435_v38 }
 0x4b6   :  { %v438_v42 = vmul.f32 %v430_v40, %v430_v40 }
 0x4b7   :  { %v441_v43 = vmul.f32 %v439_v41, %v435_v38 }
 0x4b8   :  { %v440_v44 = vmul.f32 %v438_v42, %v430_v40  ;;  %v666_v42 = vlaneseq }
 0x4b9   :  { %v443_v45 = vmul.f32 0.044715, %v441_v43  ;;  %v1077_v43 = vld [vmem:[%s1815_s3 + $0x6] ss:$0 sm:$0xff]  ;;  %s1492_s3 = smov 6  }
 0x4ba   :  { %v442_v46 = vmul.f32 0.044715, %v440_v44  ;;  %v1718_v44 = vand.u32 127, %v666_v42  ;;  %v791_v7 = vshrl.u32 %v666_v42, 7 }
 0x4bb   :  { %v445_v47 = vadd.f32 %v443_v45, %v435_v38 }
 0x4bc   :  { %v444_v48 = vadd.f32 %v442_v46, %v430_v40  ;;  %vm668_vm3 = vcmp.lt.s32.totalorder %v1718_v44, 32  ;;  %v792_v9 = vsub.s32 0, %v791_v7  ;;  %vm844_vm6 = vcmp.eq.s32.totalorder %v791_v7, %v1718_v44 }
 0x4bd   :  { %v447_v49 = vmul.f32 0.7978846, %v445_v47 }
 0x4be   :  { %v446_v50 = vmul.f32 0.7978846, %v444_v48  ;;  %v793_v10 = vrot.slane %v1764_v8, %v792_v9 }
 0x4bf   :  { %1461 = vtanh.f32 %v447_v49 }
 0x4c0   :  { %1463 = vtanh.f32 %v446_v50 }
 0x4c9   :  { %v1462_v51 = vpop.eup %1461 }
 0x4ca   :  { %v1464_v52 = vpop.eup %1463  ;;  %v451_v53 = vadd.f32 1.0, %v1462_v51 }
 0x4cb   :  { %v450_v54 = vadd.f32 1.0, %v1464_v52 }
 0x4cc   :  { %v453_v55 = vmul.f32 0.5, %v451_v53 }
 0x4cd   :  { %v452_v56 = vmul.f32 0.5, %v450_v54 }
 0x4ce   :  { %v455_v58 = vmul.f32 %v453_v55, %v435_v38 }
 0x4cf   :  { %v454_v57 = vmul.f32 %v452_v56, %v430_v40 }
 0x4d1   :  { %1253 = vmatprep.mubr.f32.mxu1 %v454_v57 }
 0x4d2   :  { %1254 = vmatmul.mubr.f32.vlgmr.msra.gmra.mrb[4].mxu1 %v455_v58 }
 0x4d3   :  { %1429 = vmatpush3.bf16.msra.mxu1 %v1426_v61 }
 0x4d4   :  { %1431 = vmatprep.subr.bf16.mxu1 %v1430_v0 }
 0x4d7   :  { %1433 = vmatpush3.bf16.msra.mxu1 %v1430_v0 }
 0x4d8   :  { %1435 = vmatprep.subr.bf16.mxu1 %v1434_v3 }
 0x4db   :  { %1437 = vmatpush3.bf16.msra.mxu1 %v1434_v3 }
 0x4dc   :  { %1439 = vmatprep.subr.bf16.mxu1 %v1438_v6 }
 0x4df   :  { %1441 = vmatpush3.bf16.msra.mxu1 %v1438_v6 }
 0x5a5   :  { %v1255_v20 = vpop.f32.mrb[4].mxu1 }
 0x5a6   :  { %v549_v21 = vadd.f32 %v1255_v20, %v1076_v19  ;;  %v543_v22 = vpop.f32.mrb[5].mxu1 }
 0x5a7   :  { %v544_v23 = vadd.f32 %v1076_v19, %v543_v22 }
 0x5a8   :  { %v553_v24 = vmul.f32 %v549_v21, %v549_v21 }
 0x5a9   :  { %v552_v25 = vmul.f32 %v544_v23, %v544_v23 }
 0x5aa   :  { %v555_v26 = vmul.f32 %v553_v24, %v549_v21 }
 0x5ab   :  { %v554_v27 = vmul.f32 %v552_v25, %v544_v23 }
 0x5ac   :  { %v557_v28 = vmul.f32 0.044715, %v555_v26 }
 0x5ad   :  { %v556_v29 = vmul.f32 0.044715, %v554_v27 }
 0x5ae   :  { %v559_v30 = vadd.f32 %v557_v28, %v549_v21 }
 0x5af   :  { %v558_v31 = vadd.f32 %v556_v29, %v544_v23 }
 0x5b0   :  { %v561_v32 = vmul.f32 0.7978846, %v559_v30 }
 0x5b1   :  { %v560_v33 = vmul.f32 0.7978846, %v558_v31 }
 0x5b2   :  { %1465 = vtanh.f32 %v561_v32 }
 0x5b3   :  { %1467 = vtanh.f32 %v560_v33 }
 0x5bc   :  { %v1466_v34 = vpop.eup %1465 }
 0x5bd   :  { %v1468_v35 = vpop.eup %1467  ;;  %v565_v36 = vadd.f32 1.0, %v1466_v34 }
 0x5be   :  { %v564_v37 = vadd.f32 1.0, %v1468_v35 }
 0x5bf   :  { %v567_v38 = vmul.f32 0.5, %v565_v36 }
 0x5c0   :  { %v566_v39 = vmul.f32 0.5, %v564_v37 }
 0x5c1   :  { %v569_v41 = vmul.f32 %v567_v38, %v549_v21 }
 0x5c2   :  { %v568_v40 = vmul.f32 %v566_v39, %v544_v23 }
 0x5c4   :  { %1288 = vmatprep.mubr.f32.mxu0 %v568_v40 }
 0x5c5   :  { %1289 = vmatmul.mubr.f32.vlgmr.msra.gmra.mrb[6].mxu0 %v569_v41 }
 0x698   :  { %v1290_v45 = vpop.f32.mrb[6].mxu0 }
 0x699   :  { %v1720_v46 = vadd.f32 %v1290_v45, %v1077_v43  ;;  %v657_v47 = vpop.f32.mrb[7].mxu0 }
 0x69a   :  { %v658_v48 = vadd.f32 %v1077_v43, %v657_v47 }
 0x69b   :  { %v670_v49 = vmul.f32 %v1720_v46, %v1720_v46 }
 0x69c   :  { %v669_v50 = vmul.f32 %v658_v48, %v658_v48 }
 0x69d   :  { %v681_v55 = vsel %vm668_vm3, 0.0, %v670_v49  ;;  %v672_v56 = vsel %vm668_vm3, %v670_v49, 0.0 }
 0x69e   :  { %v680_v51 = vsel %vm668_vm3, 0.0, %v669_v50  ;;  %v671_v52 = vsel %vm668_vm3, %v669_v50, 0.0  ;;  %v685_v57 = vsel %vm676_vm4, %v681_v55, 0.0  ;;  %v677_v58 = vsel %vm676_vm4, %v672_v56, 0.0 }
 0x69f   :  { %v682_v53 = vsel %vm36_vm0, %v680_v51, 0.0  ;;  %v673_v54 = vsel %vm36_vm0, %v671_v52, 0.0  ;;  %v1495_v56 = vmov 0.0|0.0  }
 0x6a0   :  { %683 = vadd.xlane.f32.xlu1 %v682_v53  ;;  %674 = vadd.xlane.f32.xlu0 %v673_v54 }
 0x6a1   :  { %1442 = vmatprep.subr.bf16.mxu0 %v1495_v56 }
 0x6a4   :  { %686 = vadd.xlane.f32.xlu1 %v685_v57  ;;  %678 = vadd.xlane.f32.xlu0 %v677_v58 }
 0x6ba   :  { %795 = vrot.lane.b32.xlu0 %v793_v10, %s1489_s0 }
 0x72d   :  { %v684_v11 = vpop.xlane.xlu1 %683  ;;  %v675_v12 = vpop.xlane.xlu0 %674 }
 0x72e   :  { %v692_v13 = vmax.f32 %v684_v11, 1e-24  ;;  %v688_v14 = vmax.f32 %v675_v12, 1e-24 }
 0x730   :  { %1469 = vrsqrt.f32 %v692_v13 }
 0x731   :  { %1471 = vrsqrt.f32 %v688_v14  ;;  %v687_v15 = vpop.xlane.xlu1 %686  ;;  %v679_v16 = vpop.xlane.xlu0 %678 }
 0x732   :  { %v693_v17 = vmax.f32 %v687_v15, 1e-24  ;;  %v689_v18 = vmax.f32 %v679_v16, 1e-24 }
 0x734   :  { %1473 = vrsqrt.f32 %v693_v17 }
 0x735   :  { %1475 = vrsqrt.f32 %v689_v18  ;;  %v796_v27 = vpop.permute.xlu0 %795 }
 0x73a   :  { %v1470_v19 = vpop.eup %1469 }
 0x73b   :  { %v1472_v20 = vpop.eup %1471 }
 0x73c   :  { %v696_v21 = vsel %vm668_vm3, %v1472_v20, %v1470_v19 }
 0x73d   :  { %v698_v22 = vmul.f32 %v696_v21, %v658_v48  ;;  %v1490_v48 = vmov 0.0  }
 0x73e   :  { %v1474_v23 = vpop.eup %1473  ;;  %v1784_v49 = vsel %vm844_vm6, 1.0, %v1490_v48  ;;  %1314 = vmatprep.mubr.msk.f32.mxu0 %vm1496_vm7, %v1490_v48 }
 0x73f   :  { %v1476_v24 = vpop.eup %1475  ;;  %1307 = vmatprep.mubr.msk.f32.mxu1 %vm36_vm0, %v698_v22 }
 0x740   :  { %v697_v25 = vsel %vm668_vm3, %v1476_v24, %v1474_v23 }
 0x741   :  { %v699_v26 = vmul.f32 %v697_v25, %v1720_v46 }
 0x743   :  { %1308 = vmatmul.mubr.msk.f32.vlgmr.msra.gmra.mrb[6].mxu1 %vm36_vm0, %v699_v26 }
 0x816   :  { %v1309_v28 = vpop.f32.mrb[6].mxu1 }
 0x817   :  { %v817_v29 = vmul.f32 10.0, %v1309_v28  ;;  %v780_v30 = vpop.f32.mrb[7].mxu1 }
 0x818   :  { %v798_v31 = vsub.f32 %v780_v30, %v796_v27  ;;  %v1036_v32 = vsel %vm800_vm5, %v780_v30, 0.0  ;;  %v816_v43 = vmul.f32 10.0, %v780_v30 }
 0x819   :  { %v821_v33 = vsel %vm676_vm4, %v817_v29, -inf  ;;  %v1037_v57 = vrot.slane %v1036_v32, 4 }
 0x81a   :  { %v799_v34 = vmul.f32 25.0, %v798_v31  ;;  %822 = vmax.xlane.f32.xlu0 %v821_v33  ;;  %v818_v45 = vsel %vm36_vm0, %v816_v43, -inf }
 0x81b   :  { %v1038_v58 = vadd.f32 %v1037_v57, %v1036_v32 }
 0x81c   :  { %v801_v35 = vsel %vm800_vm5, %v799_v34, -inf }
 0x81d   :  { %802 = vmax.xlane.f32.xlu1 %v801_v35  ;;  %v1039_v59 = vrot.slane %v1038_v58, 2 }
 0x81f   :  { %v1040_v60 = vadd.f32 %v1039_v59, %v1038_v58 }
 0x821   :  { %v1041_v62 = vrot.slane %v1040_v60, 1 }
 0x823   :  { %v1042_v63 = vadd.f32 %v1041_v62, %v1040_v60 }
 0x825   :  { %v1044_v2 = vmul.f32 0.5, %v1042_v63 }
 0x827   :  { %v1046_v3 = vmul.f32 0.1, %v1044_v2 }
 0x8a7   :  { %v823_v40 = vpop.xlane.xlu0 %822 }
 0x8a8   :  { %v1777_v41 = vsub.f32 %v817_v29, %v823_v40 }
 0x8aa   :  { %v803_v36 = vpop.xlane.xlu1 %802  ;;  %v828_v42 = vmul.f32 1.442695, %v1777_v41 }
 0x8ab   :  { %v804_v37 = vsub.f32 %v799_v34, %v803_v36  ;;  %v1045_v36 = vmul.f32 0.9, %v1764_v8 }
 0x8ad   :  { %v805_v38 = vmul.f32 1.442695, %v804_v37 }
 0x8af   :  { %1477 = vpow2.f32 %v805_v38 }
 0x8b0   :  { %1479 = vpow2.f32 %v828_v42 }
 0x8b9   :  { %v1478_v39 = vpop.eup %1477 }
 0x8ba   :  { %808 = vrot.lane.b32.xlu1 %v1478_v39, %s1489_s0  ;;  %v1480_v46 = vpop.eup %1479 }
 0x8bb   :  { %v833_v47 = vsel %vm676_vm4, %v1480_v46, 0.0 }
 0x8de   :  { %819 = vmax.xlane.f32.xlu1 %v818_v45 }
 0x8e2   :  { %834 = vadd.xlane.f32.xlu1 %v833_v47 }
 0x8f3   :  { %851 = vrot.lane.b32.xlu1 %v1784_v49, %s1491_s2 }
 0x8f7   :  { %854 = vrot.lane.b32.xlu1 %v1784_v49, %s1492_s3 }
 0x8fb   :  { %857 = vrot.lane.b32.xlu1 %v1784_v49, %s1493_s17 }
 0x92c   :  { %v809_v50 = vpop.permute.xlu1 %808 }
 0x92d   :  { %v811_v51 = vsel %vm676_vm4, %v809_v50, 0.0 }
 0x92e   :  { %812 = vadd.xlane.f32.xlu0 %v811_v51 }
 0x96b   :  { %v820_v52 = vpop.xlane.xlu1 %819 }
 0x96c   :  { %v824_v53 = vsub.f32 %v816_v43, %v820_v52 }
 0x96e   :  { %v826_v44 = vmul.f32 1.442695, %v824_v53 }
 0x96f   :  { %v835_v4 = vpop.xlane.xlu1 %834 }
 0x970   :  { %1481 = vpow2.f32 %v826_v44 }
 0x973   :  { %v852_v6 = vpop.permute.xlu1 %851 }
 0x977   :  { %v855_v10 = vpop.permute.xlu1 %854 }
 0x97a   :  { %v1482_v54 = vpop.eup %1481 }
 0x97b   :  { %v830_v55 = vsel %vm36_vm0, %v1482_v54, 0.0  ;;  %v858_v18 = vpop.permute.xlu1 %857  ;;  %vm1054_vm0 = vcmask 1040384  }
 0x97c   :  { %831 = vadd.xlane.f32.xlu0 %v830_v55 }
 0x992   :  { %848 = vrot.lane.b32.xlu0 %v1784_v49, %s1494_s18 }
 0x9bb   :  { %v813_v61 = vpop.xlane.xlu0 %812 }
 0x9bc   :  { %1483 = vrcp.f32 %v813_v61 }
 0x9bd   :  { %1485 = vlog2.f32 %v835_v4 }
 0x9c6   :  { %v1484_v0 = vpop.eup %1483 }
 0x9c7   :  { %v815_v1 = vmul.f32 %v1484_v0, %v1478_v39  ;;  %v1486_v9 = vpop.eup %1485 }
 0x9c8   :  { %v839_v12 = vmul.f32 0.6931472, %v1486_v9 }
 0x9c9   :  { %947 = vrot.lane.b32.xlu0 %v815_v1, %s1489_s0 }
 0x9ca   :  { %v841_v16 = vsub.f32 %v1777_v41, %v839_v12 }
 0x9cd   :  { %1048 = vrot.lane.b32.xlu0 %v1046_v3, %s1489_s0 }
 0xa09   :  { %v832_v5 = vpop.xlane.xlu0 %831 }
 0xa0a   :  { %1487 = vlog2.f32 %v832_v5 }
 0xa0d   :  { %v849_v7 = vpop.permute.xlu0 %848 }
 0xa0e   :  { %v861_v11 = vsel %vm860_vm8, %v1784_v49, %v849_v7 }
 0xa0f   :  { %v863_v15 = vsel %vm862_vm9, %v861_v11, %v852_v6 }
 0xa10   :  { %v865_v19 = vsel %vm864_vm11, %v863_v15, %v855_v10 }
 0xa11   :  { %v867_v21 = vsel %vm866_vm14, %v865_v19, %v858_v18 }
 0xa14   :  { %v1488_v13 = vpop.eup %1487 }
 0xa15   :  { %v837_v14 = vmul.f32 0.6931472, %v1488_v13 }
 0xa17   :  { %v840_v17 = vsub.f32 %v824_v53, %v837_v14 }
 0xa19   :  { %v1443_v20 = vpack.c.bf16 %v841_v16, %v840_v17 }
 0xa1b   :  { %1445 = vmatpush3.bf16.msk.msra.mxu0 %vm1444_vm13, %v1443_v20 }
 0xa1c   :  { %1317 = vmatprep.subr.mxu0 %v1490_v48 }
 0xa1e   :  { %1315 = vmatmul.mubr.msk.f32.vlgmr.msra.gmra.mrb[8].mxu0 %vm868_vm15, %v867_v21 }
 0xa1f   :  { %1319 = vmatprep.mubr.msk.f32.mxu0 %vm1496_vm7, %v1490_v48 }
 0xa3b   :  { %v948_v22 = vpop.permute.xlu0 %947 }
 0xa3c   :  { %1318 = vmatpush3.msk.msra.mxu0 %vm872_vm10, %v948_v22 }
 0xa3d   :  { %1320 = vmatmul.mubr.msk.f32.vlgmr.msra.gmra.mrb[10].mxu0 %vm860_vm8, %v1784_v49 }
 0xa3f   :  { %v1049_v37 = vpop.permute.xlu0 %1048 }
 0xa40   :  { %v1051_v38 = vadd.f32 %v1049_v37, %v1045_v36 }
 0xaf1   :  { %v942_v23 = vpop.f32.mrb[8].mxu0 }
 0xaf2   :  { %v1316_v24 = vpop.f32.mrb[9].mxu0 }
 0xb10   :  { %v1019_v25 = vpop.f32.mrb[10].mxu0 }
 0xb11   :  { %v1023_v26 = vmul.f32 %v1019_v25, %v942_v23  ;;  %v1321_v27 = vpop.f32.mrb[11].mxu0 }
 0xb13   :  { %v1024_v28 = vsel %vm676_vm4, %v1023_v26, 0.0 }
 0xb14   :  { %1025 = vadd.xlane.f32.xlu1 %v1024_v28 }
 0xba1   :  { %v1026_v29 = vpop.xlane.xlu1 %1025 }
 0xba2   :  { %v1027_v30 = vrot.slane %v1026_v29, 4 }
 0xba4   :  { %v1028_v31 = vadd.f32 %v1027_v30, %v1026_v29 }
 0xba6   :  { %v1029_v32 = vrot.slane %v1028_v31, 2 }
 0xba8   :  { %v1030_v33 = vadd.f32 %v1029_v32, %v1028_v31 }
 0xbaa   :  { %v1031_v34 = vrot.slane %v1030_v33, 1 }
 0xbac   :  { %v1032_v35 = vadd.f32 %v1031_v34, %v1030_v33 }
 0xbae   :  { %1446 = vpush %v1032_v35 }
 0xbdf   :  { %s1447_s19 = spop %1446 }
 0xbe0   :  { %s1034_s20 = ssub.f32 0.0, %s1447_s19 }
 0xbe2   :  { %s1035_s21 = smul.f32 0.5, %s1034_s20 }
 0xbe4   :  { %v1052_v39 = vstv %s1035_s21 }
 0xbe5   :  { %v1055_v40 = vsel %vm1054_vm0, %v1051_v38, %v1052_v39 }
 0xbe6   :  { %1056 = vst.msk [vmem:[%s1816_s4] sm:$0x3] %vm676_vm4, %v1055_v40 }

</bundles_post_ra>
